<compile_context>
chip_gen: v5e
topology: v5e:2x2
jax: 0.10.0
libtpu: 0.0.40
codegen_flags: <defaults>
</compile_context>

<pallas_src>
import jax
import jax.numpy as jnp
from jax.experimental import pallas as pl
from jax.experimental.pallas import tpu as pltpu


def dynamic_fc_kernel(x_ref, w1_ref, b1_ref, g_ref, beta_ref, w2_ref, b2_ref, o_ref):
    R, D_in = x_ref.shape                  # R = TB * S rows of the flattened batch tile
    H = w1_ref.shape[1]
    TB = o_ref.shape[0]
    S = R // TB

    # Linear(input_dim -> hidden) + ReLU.  MXU inputs bf16, accumulate f32.
    x2 = x_ref[...].astype(jnp.bfloat16)                    # (R, D_in)
    h = jnp.dot(x2, w1_ref[...], preferred_element_type=jnp.float32) + b1_ref[...]
    h = jnp.maximum(h, 0.0)                                  # (R, H) f32

    # LayerNorm over the hidden dim (PyTorch eps=1e-5, biased variance), f32.
    mu = jnp.mean(h, axis=-1, keepdims=True)                 # (R, 1)
    xc = h - mu
    var = jnp.mean(xc * xc, axis=-1, keepdims=True)
    inv = jax.lax.rsqrt(var + 1e-5)
    hn = xc * inv * g_ref[...] + beta_ref[...]               # (R, H)

    # Mean over the sequence dim for every batch element in the tile.
    m = jnp.mean(hn.reshape(TB, S, H), axis=1)               # (TB, H)

    # Output Linear(hidden -> output_dim_padded), batched over the TB rows.
    out = jnp.dot(m.astype(jnp.bfloat16), w2_ref[...],
                  preferred_element_type=jnp.float32) + b2_ref[...]
    o_ref[...] = out                                         # (TB, O_pad) lane-dense


def _pick_batch_tile(B, max_tb=16):
    # Largest divisor of B (<= max_tb) that still leaves >= 2 grid steps, so the
    # parallel batch axis can be split across v7x's two TensorCores; otherwise
    # just the largest divisor (e.g. B == 1).
    divs = [d for d in range(1, min(B, max_tb) + 1) if B % d == 0]
    multi = [d for d in divs if B // d >= 2]
    return max(multi) if multi else max(divs)


def dynamic_fc_forward(x, w1, b1, gamma, beta, w2, b2, *, block_b=None):
    B, S, D_in = x.shape
    H = w1.shape[1]
    O = w2.shape[1]

    TB = _pick_batch_tile(B) if block_b is None else block_b
    assert B % TB == 0, "batch tile must divide batch"

    # Lane-dense output: pad output_dim up to a multiple of 128 with zero
    # weight/bias columns; the padded columns are exactly 0 and are sliced off.
    O_pad = ((O + 127) // 128) * 128
    w2_p = jnp.zeros((H, O_pad), jnp.float32).at[:, :O].set(w2)
    b2_p = jnp.zeros((1, O_pad), jnp.float32).at[:, :O].set(b2.reshape(1, O))

    # Weights feeding the MXU cast to bf16 once (halves weight DMA / VMEM);
    # biases & LayerNorm params stay f32.
    w1_bf = w1.astype(jnp.bfloat16)
    w2_bf = w2_p.astype(jnp.bfloat16)
    b1_r = b1.reshape(1, H)
    g_r = gamma.reshape(1, H)
    be_r = beta.reshape(1, H)

    # Pre-flatten x so each grid step sees a plain 2-D (TB*S, D_in) slab (free
    # metadata reshape in XLA; avoids an in-kernel relayout before the matmul).
    x2d = x.reshape(B * S, D_in)

    cost = pl.CostEstimate(
        flops=2 * B * S * D_in * H + 2 * B * H * O_pad,
        transcendentals=B * S,                       # one rsqrt per token
        bytes_accessed=(x2d.size * 4 + w1_bf.size * 2 + w2_bf.size * 2
                        + (b1_r.size + g_r.size + be_r.size + b2_p.size) * 4
                        + B * O_pad * 4),
    )

    # TODO(synk): if input_dim/hidden_dim ever scale up, K-block w1 (extra grid
    # axis over D_in) so the full weight need not stay VMEM-resident on v7x's
    # 64 MiB VMEM; at these sizes whole-weight-resident is far below the limit.
    out = pl.pallas_call(
        dynamic_fc_kernel,
        out_shape=jax.ShapeDtypeStruct((B, O_pad), jnp.float32),
        grid_spec=pltpu.PrefetchScalarGridSpec(
            num_scalar_prefetch=0,
            grid=(B // TB,),
            in_specs=[
                pl.BlockSpec((TB * S, D_in), lambda b: (b, 0)),
                pl.BlockSpec((D_in, H), lambda b: (0, 0)),
                pl.BlockSpec((1, H), lambda b: (0, 0)),
                pl.BlockSpec((1, H), lambda b: (0, 0)),
                pl.BlockSpec((1, H), lambda b: (0, 0)),
                pl.BlockSpec((H, O_pad), lambda b: (0, 0)),
                pl.BlockSpec((1, O_pad), lambda b: (0, 0)),
            ],
            out_specs=pl.BlockSpec((TB, O_pad), lambda b: (b, 0)),
        ),
        compiler_params=pltpu.CompilerParams(
            dimension_semantics=("parallel",)),
        cost_estimate=cost,
    )(x2d, w1_bf, b1_r, g_r, be_r, w2_bf, b2_p)

    return {"output": out[:, :O]}


def init_params(key, input_dim, hidden_dim, output_dim):
    # Deterministic synthetic init mimicking nn.Linear's U(-1/sqrt(fan_in), 1/sqrt(fan_in)).
    k1, k2, k3, k4 = jax.random.split(key, 4)
    lim1 = 1.0 / jnp.sqrt(input_dim)
    lim2 = 1.0 / jnp.sqrt(hidden_dim)
    w1 = jax.random.uniform(k1, (input_dim, hidden_dim), jnp.float32, -lim1, lim1)
    b1 = jax.random.uniform(k2, (hidden_dim,), jnp.float32, -lim1, lim1)
    gamma = jnp.ones((hidden_dim,), jnp.float32)   # LayerNorm weight
    beta = jnp.zeros((hidden_dim,), jnp.float32)   # LayerNorm bias
    w2 = jax.random.uniform(k3, (hidden_dim, output_dim), jnp.float32, -lim2, lim2)
    b2 = jax.random.uniform(k4, (output_dim,), jnp.float32, -lim2, lim2)
    return w1, b1, gamma, beta, w2, b2


def reference_forward(x, w1, b1, gamma, beta, w2, b2, matmul_dtype=jnp.float32):
    dt = matmul_dtype
    h = jnp.einsum("bsd,dh->bsh", x.astype(dt), w1.astype(dt),
                   preferred_element_type=jnp.float32) + b1
    h = jnp.maximum(h, 0.0)
    mu = jnp.mean(h, axis=-1, keepdims=True)
    var = jnp.mean((h - mu) ** 2, axis=-1, keepdims=True)
    hn = (h - mu) * jax.lax.rsqrt(var + 1e-5) * gamma + beta
    m = jnp.mean(hn, axis=1)
    return jnp.dot(m.astype(dt), w2.astype(dt),
                   preferred_element_type=jnp.float32) + b2


if __name__ == "__main__":
    # Module defaults: layer_dim_list=[256] -> hidden=256; small batch/seq/dims.
    B, S, D_in, H, O = 16, 8, 32, 256, 16
    key = jax.random.PRNGKey(0)
    kx, kp = jax.random.split(key)
    x = jax.random.normal(kx, (B, S, D_in), jnp.float32)
    params = init_params(kp, D_in, H, O)

    out = dynamic_fc_forward(x, *params)["output"]
    out = jax.block_until_ready(out)
    assert out.shape == (B, O)

    # Tight check against a reference using the same MXU precision strategy
    # (bf16 matmul inputs, f32 accumulation)...
    ref_bf16 = reference_forward(x, *params, matmul_dtype=jnp.bfloat16)
    assert jnp.allclose(out, ref_bf16, atol=5e-3, rtol=5e-3)
    # ...and a looser check against the pure-f32 PyTorch-equivalent math.
    ref_f32 = reference_forward(x, *params, matmul_dtype=jnp.float32)
    assert jnp.allclose(out, ref_f32, atol=3e-2, rtol=3e-2)

    print("KERNEL_OK")
</pallas_src>

<mosaic_0001>
module attributes {stable_mosaic.version = 11 : i64} {
  func.func @dynamic_fc_kernel(%arg0: i32, %arg1: memref<64x32xf32, #tpu.memory_space<vmem>>, %arg2: memref<32x256xbf16, #tpu.memory_space<vmem>>, %arg3: memref<1x256xf32, #tpu.memory_space<vmem>>, %arg4: memref<1x256xf32, #tpu.memory_space<vmem>>, %arg5: memref<1x256xf32, #tpu.memory_space<vmem>>, %arg6: memref<256x128xbf16, #tpu.memory_space<vmem>>, %arg7: memref<1x128xf32, #tpu.memory_space<vmem>>, %arg8: memref<8x128xf32, #tpu.memory_space<vmem>>) attributes {dimension_semantics = [#tpu.dimension_semantics<parallel>], iteration_bounds = array<i64: 2>, scalar_prefetch = 0 : i64, scratch_operands = 0 : i64, tpu.core_type = #tpu.core_type<tc>, window_params = [{transform_indices = @transform_0, window_bounds = array<i64: 64, 32>}, {pipeline_mode = #tpu.pipeline_mode<synchronous>, transform_indices = @transform_1, window_bounds = array<i64: 32, 256>}, {pipeline_mode = #tpu.pipeline_mode<synchronous>, transform_indices = @transform_2, window_bounds = array<i64: 1, 256>}, {pipeline_mode = #tpu.pipeline_mode<synchronous>, transform_indices = @transform_3, window_bounds = array<i64: 1, 256>}, {pipeline_mode = #tpu.pipeline_mode<synchronous>, transform_indices = @transform_4, window_bounds = array<i64: 1, 256>}, {pipeline_mode = #tpu.pipeline_mode<synchronous>, transform_indices = @transform_5, window_bounds = array<i64: 256, 128>}, {pipeline_mode = #tpu.pipeline_mode<synchronous>, transform_indices = @transform_6, window_bounds = array<i64: 1, 128>}, {transform_indices = @transform_7, window_bounds = array<i64: 8, 128>}]} {
    %c0 = arith.constant 0 : index
    %c0_0 = arith.constant 0 : index
    %0 = vector.load %arg1[%c0, %c0_0] : memref<64x32xf32, #tpu.memory_space<vmem>>, vector<64x32xf32>
    %1 = arith.truncf %0 : vector<64x32xf32> to vector<64x32xbf16>
    %c0_1 = arith.constant 0 : index
    %c0_2 = arith.constant 0 : index
    %2 = vector.load %arg2[%c0_1, %c0_2] : memref<32x256xbf16, #tpu.memory_space<vmem>>, vector<32x256xbf16>
    %cst = arith.constant dense<0.000000e+00> : vector<64x256xf32>
    %3 = tpu.matmul %1, %2, %cst {dimension_numbers = #tpu.dot_dimension_numbers<[1], [0], [0], [1], [0, 0, 1, 1], [], []>} : vector<64x32xbf16>, vector<32x256xbf16>, vector<64x256xf32> -> vector<64x256xf32>
    %c0_3 = arith.constant 0 : index
    %c0_4 = arith.constant 0 : index
    %4 = vector.load %arg3[%c0_3, %c0_4] : memref<1x256xf32, #tpu.memory_space<vmem>>, vector<1x256xf32>
    %5 = vector.broadcast %4 : vector<1x256xf32> to vector<64x256xf32>
    %6 = arith.addf %3, %5 : vector<64x256xf32>
    %cst_5 = arith.constant 0.000000e+00 : f32
    %7 = vector.broadcast %cst_5 : f32 to vector<64x256xf32>
    %8 = arith.maximumf %6, %7 : vector<64x256xf32>
    %cst_6 = arith.constant dense<0.000000e+00> : vector<64xf32>
    %9 = vector.multi_reduction <add>, %8, %cst_6 [1] : vector<64x256xf32> to vector<64xf32>
    %10 = vector.shape_cast %9 : vector<64xf32> to vector<64x1xf32>
    %cst_7 = arith.constant 2.560000e+02 : f32
    %11 = vector.broadcast %cst_7 : f32 to vector<64x1xf32>
    %12 = arith.divf %10, %11 : vector<64x1xf32>
    %13 = vector.broadcast %12 : vector<64x1xf32> to vector<64x256xf32>
    %14 = arith.subf %8, %13 : vector<64x256xf32>
    %15 = arith.mulf %14, %14 : vector<64x256xf32>
    %cst_8 = arith.constant dense<0.000000e+00> : vector<64xf32>
    %16 = vector.multi_reduction <add>, %15, %cst_8 [1] : vector<64x256xf32> to vector<64xf32>
    %17 = vector.shape_cast %16 : vector<64xf32> to vector<64x1xf32>
    %cst_9 = arith.constant 2.560000e+02 : f32
    %18 = vector.broadcast %cst_9 : f32 to vector<64x1xf32>
    %19 = arith.divf %17, %18 : vector<64x1xf32>
    %cst_10 = arith.constant 9.99999974E-6 : f32
    %20 = vector.broadcast %cst_10 : f32 to vector<64x1xf32>
    %21 = arith.addf %19, %20 : vector<64x1xf32>
    %22 = math.rsqrt %21 : vector<64x1xf32>
    %23 = vector.broadcast %22 : vector<64x1xf32> to vector<64x256xf32>
    %24 = arith.mulf %14, %23 : vector<64x256xf32>
    %c0_11 = arith.constant 0 : index
    %c0_12 = arith.constant 0 : index
    %25 = vector.load %arg4[%c0_11, %c0_12] : memref<1x256xf32, #tpu.memory_space<vmem>>, vector<1x256xf32>
    %26 = vector.broadcast %25 : vector<1x256xf32> to vector<64x256xf32>
    %27 = arith.mulf %24, %26 : vector<64x256xf32>
    %c0_13 = arith.constant 0 : index
    %c0_14 = arith.constant 0 : index
    %28 = vector.load %arg5[%c0_13, %c0_14] : memref<1x256xf32, #tpu.memory_space<vmem>>, vector<1x256xf32>
    %29 = vector.broadcast %28 : vector<1x256xf32> to vector<64x256xf32>
    %30 = arith.addf %27, %29 : vector<64x256xf32>
    %31 = vector.shape_cast %30 : vector<64x256xf32> to vector<8x8x256xf32>
    %cst_15 = arith.constant dense<0.000000e+00> : vector<8x256xf32>
    %32 = vector.multi_reduction <add>, %31, %cst_15 [1] : vector<8x8x256xf32> to vector<8x256xf32>
    %cst_16 = arith.constant 8.000000e+00 : f32
    %33 = vector.broadcast %cst_16 : f32 to vector<8x256xf32>
    %34 = arith.divf %32, %33 : vector<8x256xf32>
    %35 = arith.truncf %34 : vector<8x256xf32> to vector<8x256xbf16>
    %c0_17 = arith.constant 0 : index
    %c0_18 = arith.constant 0 : index
    %36 = vector.load %arg6[%c0_17, %c0_18] : memref<256x128xbf16, #tpu.memory_space<vmem>>, vector<256x128xbf16>
    %cst_19 = arith.constant dense<0.000000e+00> : vector<8x128xf32>
    %37 = tpu.matmul %35, %36, %cst_19 {dimension_numbers = #tpu.dot_dimension_numbers<[1], [0], [0], [1], [0, 0, 1, 1], [], []>} : vector<8x256xbf16>, vector<256x128xbf16>, vector<8x128xf32> -> vector<8x128xf32>
    %c0_20 = arith.constant 0 : index
    %c0_21 = arith.constant 0 : index
    %38 = vector.load %arg7[%c0_20, %c0_21] : memref<1x128xf32, #tpu.memory_space<vmem>>, vector<1x128xf32>
    %39 = vector.broadcast %38 : vector<1x128xf32> to vector<8x128xf32>
    %40 = arith.addf %37, %39 : vector<8x128xf32>
    %c0_22 = arith.constant 0 : index
    %c0_23 = arith.constant 0 : index
    %41 = vector.load %arg8[%c0_22, %c0_23] : memref<8x128xf32, #tpu.memory_space<vmem>>, vector<8x128xf32>
    tpu.vector_store %arg8[%c0_22, %c0_23], %40 {strides = array<i32>} : memref<8x128xf32, #tpu.memory_space<vmem>>, vector<8x128xf32>,
    return
  }
  func.func @transform_0(%arg0: i32) -> (i32, i32) {
    %c0_i32 = arith.constant 0 : i32
    %c0_i32_0 = arith.constant 0 : i32
    return %arg0, %c0_i32 : i32, i32
  }
  func.func @transform_1(%arg0: i32) -> (i32, i32) {
    %c0_i32 = arith.constant 0 : i32
    %c0_i32_0 = arith.constant 0 : i32
    %c0_i32_1 = arith.constant 0 : i32
    return %c0_i32, %c0_i32_0 : i32, i32
  }
  func.func @transform_2(%arg0: i32) -> (i32, i32) {
    %c0_i32 = arith.constant 0 : i32
    %c0_i32_0 = arith.constant 0 : i32
    %c0_i32_1 = arith.constant 0 : i32
    return %c0_i32, %c0_i32_0 : i32, i32
  }
  func.func @transform_3(%arg0: i32) -> (i32, i32) {
    %c0_i32 = arith.constant 0 : i32
    %c0_i32_0 = arith.constant 0 : i32
    %c0_i32_1 = arith.constant 0 : i32
    return %c0_i32, %c0_i32_0 : i32, i32
  }
  func.func @transform_4(%arg0: i32) -> (i32, i32) {
    %c0_i32 = arith.constant 0 : i32
    %c0_i32_0 = arith.constant 0 : i32
    %c0_i32_1 = arith.constant 0 : i32
    return %c0_i32, %c0_i32_0 : i32, i32
  }
  func.func @transform_5(%arg0: i32) -> (i32, i32) {
    %c0_i32 = arith.constant 0 : i32
    %c0_i32_0 = arith.constant 0 : i32
    %c0_i32_1 = arith.constant 0 : i32
    return %c0_i32, %c0_i32_0 : i32, i32
  }
  func.func @transform_6(%arg0: i32) -> (i32, i32) {
    %c0_i32 = arith.constant 0 : i32
    %c0_i32_0 = arith.constant 0 : i32
    %c0_i32_1 = arith.constant 0 : i32
    return %c0_i32, %c0_i32_0 : i32, i32
  }
  func.func @transform_7(%arg0: i32) -> (i32, i32) {
    %c0_i32 = arith.constant 0 : i32
    %c0_i32_0 = arith.constant 0 : i32
    return %arg0, %c0_i32 : i32, i32
  }
}

</mosaic_0001>

<bundles_post_ra>
// kernel: tpu_custom_call.1
= control target key start
LH: loop header
LB: loop body
LE: loop exit
PB: predicated region body
PF: predicated region fallthrough
CT: control target
= control target key end

     0   :  { %12 = vsyncpa [#allocation3], 0  ;;  %s1987_s0 = inlined_call_operand.vmem [shape: f32[128,32], index: 0, kind: input, shape index: {}]   ;;  %s1988_s1 = inlined_call_operand.vmem [shape: bf16[32,256], index: 1, kind: input, shape index: {}]   ;;  %s1989_s2 = inlined_call_operand.vmem [shape: f32[1,256], index: 2, kind: input, shape index: {}]   ;;  %s1990_s3 = inlined_call_operand.vmem [shape: f32[1,256], index: 3, kind: input, shape index: {}]   ;;  %s1991_s4 = inlined_call_operand.hbm [shape: f32[1,256], index: 4, kind: input, shape index: {}]   ;;  %s1992_s5 = inlined_call_operand.vmem [shape: bf16[256,128], index: 5, kind: input, shape index: {}]   ;;  %s1993_s6 = inlined_call_operand.vmem [shape: f32[1,128], index: 6, kind: input, shape index: {}]   ;;  %s1994_s7 = inlined_call_operand.hbm [shape: f32[16,128], index: 7, kind: output, shape index: {}]  }
   0x1   :  { %13 = vsyncpa [#allocation4], 0 }
   0x2   :  { %15 = vsyncpa [#allocation4 + $0x1], 0  ;;  %s1448_s24 = smov 0   ;;  %s1450_s25 = smov 0  }
   0x3   :  { %s1452_s26 = smov 0   ;;  %s1454_s27 = smov 0  }
   0x4 LB: > { %s1112_s28 = sadd.s32 4294967295, %s1403_s27   ;;  %s1113_s29 = sadd.s32 4294967294, %s1403_s27   ;;  %s1403_s27 = sphi %s1454_s27, %s2000_s27   ;;  %s1399_s26 = sphi %s1452_s26, %s1999_s26   ;;  %s1395_s25 = sphi %s1450_s25, %s1998_s25   ;;  %s1391_s24 = sphi %s1448_s24, %s1997_s24  }
   0x5   : > { %s1471_s30 = sadd.s32 1, %s1403_s27   ;;  %s180_s8 = sadd.s32 1, %s1399_s26 }
   0x6   : > { %s177_s9 = ssub.s32 %s1403_s27, %s1471_s30  ;;  %p190_p0 = scmp.ne.s32.totalorder %s1399_s26, %s1395_s25 }
   0x7   : > { %p178_p1 = scmp.eq.s32.totalorder %s177_s9, 0  ;;  %p191_p2 = scmp.eq.s32.totalorder %s1112_s28, 1 }
   0x8   : > { %p196_p3 = scmp.ne.s32.totalorder %s1395_s25, %s1391_s24  ;;  %p197_p4 = scmp.eq.s32.totalorder %s1113_s29, 1 }
   0x9   : > { %s1481_s10 = scalar_select %p178_p1, %s1399_s26, %s180_s8  }
   0xa   : > { %p1483_p5 = por %p191_p2, %p190_p0  ;;  %p1487_p6 = por %p197_p4, %p196_p3 }
   0xb   : > { %p1114_p7 = scmp.ge.s32.totalorder %s1403_s27, 1  ;;  %p204_p8 = scmp.lt.s32.totalorder %s1403_s27, 3 }
   0xc   : > { %p1248_p9 = scmp.eq.s32.totalorder %s1112_s28, 0  ;;  %s225_s15 = sshll.u32 %s1991_s4, 4  ;;  %s226_s15 = int_to_ptr.hbm [resolvable:$true] %s225_s15 }
   0xd   : > { %p205_p10 = pnand %p1114_p7, %p204_p8  ;;  %s1405_s16 = smov [#allocation2]  }
   0xe   : > { %s227_s17 = sshll.u32 %s1405_s16, 4  ;;  %s228_s17 = int_to_ptr.vmem [resolvable:$true] %s227_s17 }
   0xf   : > { %p1240_p11 = pneg %p205_p10  ;;  %255 = sbr.rel (%p205_p10) target bundleno = 650 (0x28a), region = 48 }
  0x11   : > { %p1241_p12 = pnand %p1248_p9, %p1240_p11 }
  0x13   : > { %1243 = dma.hbm_to_vmem [thread:$0]  (!%p1241_p12), %s226_s15, 32, %s228_s17, [#allocation3]  }
  0x14   : > { %1382 = dma.done.wait (%p1248_p9), [#allocation3], 32  }
  0x15   : > { %1384 = vsyncadd (%p1248_p9), [#allocation3], 4294967264  ;;  %s1496_s18 = sshll.u32 %s1112_s28, 3  ;;  %v1132_v0 = vld [vmem:[%s1988_s1 + $0x10] sm:$0xf]  ;;  %vm337_vm0 = vcmask 261120  }
  0x16   : > { %p289_p13 = scmp.lt.s32.totalorder %s1496_s18, 15  ;;  %v1217_v1 = vld [vmem:[%s1988_s1 + $0x14] sm:$0xf0]  ;;  %v1216_v2 = vld [vmem:[%s1988_s1 + $0x14] sm:$0xf]  ;;  %s285_s21 = sand.u32 1, %s1395_s25  }
  0x17   : > { %v1133_v3 = vor.u32 %v1217_v1, %v1132_v0  ;;  %v1134_v4 = vld [vmem:[%s1988_s1 + $0x18] sm:$0xf0]  ;;  %v1124_v5 = vld [vmem:[%s1988_s1] sm:$0xf]  ;;  %v1215_v6 = vld [vmem:[%s1988_s1 + $0x4] sm:$0xf0]  ;;  %s1037_s9 = scalar_lea.hbm %s1994_s7, %s1496_s18 }
  0x18   : > { %s290_s19 = scalar_select %p289_p13, %s1496_s18, 15  ;;  %v1137_v7 = vor.u32 %v1216_v2, %v1134_v4  ;;  %v1214_v8 = vld [vmem:[%s1988_s1 + $0x4] sm:$0xf]  ;;  %v1126_v9 = vld [vmem:[%s1988_s1 + $0x8] sm:$0xf0]  ;;  %v1125_v10 = vor.u32 %v1215_v6, %v1124_v5 }
  0x19   : > { %356 = vmatpush.bf16.msra.mxu0 %v1133_v3  ;;  %v1129_v13 = vor.u32 %v1214_v8, %v1126_v9  ;;  %v311_v24 = vld [vmem:[%s1989_s2] sm:$0x3]  ;;  %s1119_s22 = sshll.u32 %s285_s21, 3  ;;  %s1027_s15 = scalar_lea.sflag [#allocation4], %s285_s21 }
  0x1a   : > { %s1121_s20 = sshll.u32 %s290_s19, 3  ;;  %385 = vmatpush.bf16.msra.mxu1 %v1137_v7  ;;  %v313_v25 = vperm.slane %v311_v24, 0  ;;  %v314_v26 = vperm.slane %v311_v24, 1  ;;  %s287_s13 = scalar_lea.vmem [#allocation5], %s1119_s22 }
  0x1b   : > { %s1512_s14 = scalar_lea.vmem %s1987_s0, %s1121_s20  ;;  %s1039_s28 = sshll.u32 %s287_s13, 4  ;;  %s1040_s28 = int_to_ptr.vmem [resolvable:$true] %s1039_s28 }
  0x1c   : > { %v295_v11 = vld [vmem:[%s1512_s14] sm:$0xff]  ;;  %v296_v12 = vld [vmem:[%s1512_s14 + $0x8] sm:$0xff]  ;;  %v297_v15 = vld [vmem:[%s1512_s14 + $0x10] sm:$0xff]  ;;  %s1357_s23 = scalar_lea.hbm %s1994_s7, 16 }
  0x1d   : > { %v303_v14 = vpack.c.bf16 %v296_v12, %v295_v11  ;;  %357 = vmatpush.bf16.msra.mxu0 %v1125_v10  ;;  %v298_v16 = vld [vmem:[%s1512_s14 + $0x18] sm:$0xff]  ;;  %v299_v18 = vld [vmem:[%s1512_s14 + $0x20] sm:$0xff]  ;;  %v300_v19 = vld [vmem:[%s1512_s14 + $0x28] sm:$0xff] }
  0x1e   : > { %386 = vmatpush.bf16.msra.mxu1 %v1129_v13  ;;  %v304_v17 = vpack.c.bf16 %v298_v16, %v297_v15  ;;  %v305_v20 = vpack.c.bf16 %v300_v19, %v299_v18  ;;  %v301_v21 = vld [vmem:[%s1512_s14 + $0x30] sm:$0xff]  ;;  %v302_v22 = vld [vmem:[%s1512_s14 + $0x38] sm:$0xff]  ;;  %v1406_v19 = vmov 256.0   ;;  %s1041_s14 = sshll.u32 %s1037_s9, 4  ;;  %s1042_s14 = int_to_ptr.hbm [resolvable:$true] %s1041_s14 }
  0x1f   : > { %v306_v23 = vpack.c.bf16 %v302_v22, %v301_v21  ;;  %1287 = vrcp.f32 %v1406_v19  ;;  %s1351_s16 = sshra.s32 %s1042_s14, 4  ;;  %s1352_s16 = int_to_ptr.hbm [resolvable:$true] %s1351_s16 }
  0x20   : > { %1138 = vmatmul.msk.bf16.vlgmr.msra.gmra.mxu0 %vm337_vm0, %v303_v14  ;;  %s1353_s17 = scalar_lea.hbm %s1352_s16, 8  ;;  %p1358_p3 = scmp.lt.s32.totalorder %s1352_s16, %s1994_s7 }
  0x21   : > { %1142 = vmatmul.msk.bf16.vlgmr.msra.gmra.mxu1 %vm337_vm0, %v303_v14  ;;  %p1354_p0 = scmp.ne.s32.totalorder %s1352_s16, %s1353_s17  ;;  %p1359_p4 = scmp.lt.s32.totalorder %s1357_s23, %s1353_s17 }
  0x23   : > { %p1355_p1 = pnand %p1354_p0, %p1483_p5  ;;  %p1360_p7 = por %p1359_p4, %p1358_p3 }
  0x25   : > { %p1356_p2 = pneg %p1355_p1 }
  0x27   : > { %p1361_p8 = pnand %p1360_p7, %p1356_p2 }
  0x30   : > { %1139 = vmatmul.msk.bf16.gmra.mxu0 %vm337_vm0, %v304_v17 }
  0x31   : > { %1143 = vmatmul.msk.bf16.gmra.mxu1 %vm337_vm0, %v304_v17 }
  0x40   : > { %1140 = vmatmul.msk.bf16.gmra.mxu0 %vm337_vm0, %v305_v20 }
  0x41   : > { %1144 = vmatmul.msk.bf16.gmra.mxu1 %vm337_vm0, %v305_v20  ;;  %v1288_v20 = vpop.eup %1287 }
  0x42   : > { %v449_v21 = vmul.f32 256.0, %v1288_v20  ;;  %vm453_vm1 = vweird.f32 %v1288_v20 }
  0x44   : > { %v450_v22 = vsub.f32 1.0, %v449_v21 }
  0x50   : > { %1141 = vmatmul.msk.bf16.gmra.mxu0 %vm337_vm0, %v306_v23 }
  0x51   : > { %1145 = vmatmul.msk.bf16.gmra.mxu1 %vm337_vm0, %v306_v23  ;;  %v451_v23 = vmul.f32 %v1288_v20, %v450_v22 }
  0x53   : > { %v452_v24 = vadd.f32 %v1288_v20, %v451_v23 }
  0x9d   : > { %v359_v27 = vpop.f32.mrf.mxu0 }
  0x9e   : > { %v1548_v28 = vadd.f32 %v359_v27, %v313_v25  ;;  %v388_v29 = vpop.f32.mrf.mxu1 }
  0x9f   : > { %v1550_v30 = vadd.f32 %v388_v29, %v314_v26 }
  0xa0   : > { %v408_v31 = vmax.f32 %v1548_v28, 0.0 }
  0xa1   : > { %v409_v32 = vmax.f32 %v1550_v30, 0.0 }
  0xa3   : > { %v424_v33 = vadd.f32 %v409_v32, %v408_v31 }
  0xa5   : > { %425 = vadd.xlane.f32.xlu0 %v424_v33  ;;  %v361_v34 = vpop.f32.mrf.mxu0 }
  0xa6   : > { %v1558_v35 = vadd.f32 %v361_v34, %v313_v25  ;;  %v390_v36 = vpop.f32.mrf.mxu1 }
  0xa7   : > { %v1560_v37 = vadd.f32 %v390_v36, %v314_v26 }
  0xa8   : > { %v410_v38 = vmax.f32 %v1558_v35, 0.0 }
  0xa9   : > { %v411_v39 = vmax.f32 %v1560_v37, 0.0 }
  0xab   : > { %v427_v40 = vadd.f32 %v411_v39, %v410_v38 }
  0xad   : > { %428 = vadd.xlane.f32.xlu0 %v427_v40  ;;  %v364_v41 = vpop.f32.mrf.mxu0 }
  0xae   : > { %v1568_v42 = vadd.f32 %v364_v41, %v313_v25  ;;  %v393_v43 = vpop.f32.mrf.mxu1 }
  0xaf   : > { %v1570_v44 = vadd.f32 %v393_v43, %v314_v26 }
  0xb0   : > { %v412_v45 = vmax.f32 %v1568_v42, 0.0 }
  0xb1   : > { %v413_v46 = vmax.f32 %v1570_v44, 0.0 }
  0xb3   : > { %v430_v47 = vadd.f32 %v413_v46, %v412_v45 }
  0xb5   : > { %431 = vadd.xlane.f32.xlu1 %v430_v47  ;;  %v366_v48 = vpop.f32.mrf.mxu0 }
  0xb6   : > { %v1578_v49 = vadd.f32 %v366_v48, %v313_v25  ;;  %v395_v50 = vpop.f32.mrf.mxu1 }
  0xb7   : > { %v1580_v51 = vadd.f32 %v395_v50, %v314_v26 }
  0xb8   : > { %v414_v52 = vmax.f32 %v1578_v49, 0.0 }
  0xb9   : > { %v415_v53 = vmax.f32 %v1580_v51, 0.0 }
  0xbb   : > { %v433_v54 = vadd.f32 %v415_v53, %v414_v52 }
  0xbd   : > { %434 = vadd.xlane.f32.xlu1 %v433_v54  ;;  %v369_v55 = vpop.f32.mrf.mxu0 }
  0xbe   : > { %v1588_v56 = vadd.f32 %v369_v55, %v313_v25  ;;  %v398_v57 = vpop.f32.mrf.mxu1 }
  0xbf   : > { %v1590_v58 = vadd.f32 %v398_v57, %v314_v26 }
  0xc0   : > { %v416_v59 = vmax.f32 %v1588_v56, 0.0 }
  0xc1   : > { %v417_v60 = vmax.f32 %v1590_v58, 0.0 }
  0xc3   : > { %v436_v61 = vadd.f32 %v417_v60, %v416_v59 }
  0xc5   : > { %437 = vadd.xlane.f32.xlu2 %v436_v61  ;;  %v371_v62 = vpop.f32.mrf.mxu0 }
  0xc6   : > { %v1598_v63 = vadd.f32 %v371_v62, %v313_v25  ;;  %v400_v0 = vpop.f32.mrf.mxu1 }
  0xc7   : > { %v1600_v1 = vadd.f32 %v400_v0, %v314_v26 }
  0xc8   : > { %v418_v2 = vmax.f32 %v1598_v63, 0.0 }
  0xc9   : > { %v419_v3 = vmax.f32 %v1600_v1, 0.0 }
  0xcb   : > { %v439_v4 = vadd.f32 %v419_v3, %v418_v2 }
  0xcd   : > { %440 = vadd.xlane.f32.xlu2 %v439_v4  ;;  %v374_v5 = vpop.f32.mrf.mxu0 }
  0xce   : > { %v1608_v6 = vadd.f32 %v374_v5, %v313_v25  ;;  %v403_v7 = vpop.f32.mrf.mxu1 }
  0xcf   : > { %v1610_v8 = vadd.f32 %v403_v7, %v314_v26 }
  0xd0   : > { %v420_v9 = vmax.f32 %v1608_v6, 0.0 }
  0xd1   : > { %v421_v10 = vmax.f32 %v1610_v8, 0.0 }
  0xd3   : > { %v442_v11 = vadd.f32 %v421_v10, %v420_v9 }
  0xd5   : > { %443 = vadd.xlane.f32.xlu0 %v442_v11  ;;  %v376_v12 = vpop.f32.mrf.mxu0 }
  0xd6   : > { %v1618_v13 = vadd.f32 %v376_v12, %v313_v25  ;;  %v405_v14 = vpop.f32.mrf.mxu1  ;;  %v1628_v25 = vsel %vm453_vm1, %v1288_v20, %v452_v24 }
  0xd7   : > { %v1620_v15 = vadd.f32 %v405_v14, %v314_v26 }
  0xd8   : > { %v422_v16 = vmax.f32 %v1618_v13, 0.0 }
  0xd9   : > { %v423_v17 = vmax.f32 %v1620_v15, 0.0 }
  0xdb   : > { %v445_v18 = vadd.f32 %v423_v17, %v422_v16 }
  0xdd   : > { %446 = vadd.xlane.f32.xlu1 %v445_v18 }
 0x118   : > { %v426_v26 = vpop.xlane.xlu0 %425 }
 0x119   : > { %v455_v27 = vmul.f32 %v1628_v25, %v426_v26 }
 0x11b   : > { %v1633_v29 = vsub.f32 %v408_v31, %v455_v27  ;;  %v1637_v33 = vsub.f32 %v409_v32, %v455_v27 }
 0x11d   : > { %v479_v34 = vmul.f32 %v1633_v29, %v1633_v29  ;;  %v480_v36 = vmul.f32 %v1637_v33, %v1637_v33 }
 0x11f   : > { %v495_v40 = vadd.f32 %v480_v36, %v479_v34 }
 0x120   : > { %v429_v41 = vpop.xlane.xlu0 %428 }
 0x121   : > { %v456_v43 = vmul.f32 %v1628_v25, %v429_v41  ;;  %496 = vadd.xlane.f32.xlu2 %v495_v40 }
 0x123   : > { %v1646_v28 = vsub.f32 %v410_v38, %v456_v43  ;;  %v1650_v30 = vsub.f32 %v411_v39, %v456_v43 }
 0x125   : > { %v481_v31 = vmul.f32 %v1646_v28, %v1646_v28  ;;  %v482_v32 = vmul.f32 %v1650_v30, %v1650_v30 }
 0x127   : > { %v498_v47 = vadd.f32 %v482_v32, %v481_v31  ;;  %v631_v31 = vld [vmem:[%s1990_s3] sm:$0x3] }
 0x128   : > { %v432_v48 = vpop.xlane.xlu1 %431 }
 0x129   : > { %v457_v50 = vmul.f32 %v1628_v25, %v432_v48  ;;  %499 = vadd.xlane.f32.xlu0 %v498_v47 }
 0x12b   : > { %v1659_v35 = vsub.f32 %v412_v45, %v457_v50  ;;  %v1663_v37 = vsub.f32 %v413_v46, %v457_v50  ;;  %v1740_v50 = vperm.slane %v631_v31, 0 }
 0x12d   : > { %v483_v38 = vmul.f32 %v1659_v35, %v1659_v35  ;;  %v484_v39 = vmul.f32 %v1663_v37, %v1663_v37 }
 0x12f   : > { %v501_v54 = vadd.f32 %v484_v39, %v483_v38 }
 0x130   : > { %v435_v55 = vpop.xlane.xlu1 %434 }
 0x131   : > { %v458_v57 = vmul.f32 %v1628_v25, %v435_v55  ;;  %502 = vadd.xlane.f32.xlu1 %v501_v54  ;;  %v653_v54 = vld [vmem:[#allocation2] sm:$0x3] }
 0x133   : > { %v1672_v42 = vsub.f32 %v414_v52, %v458_v57  ;;  %v1676_v44 = vsub.f32 %v415_v53, %v458_v57  ;;  %v1743_v57 = vperm.slane %v631_v31, 1 }
 0x135   : > { %v485_v45 = vmul.f32 %v1672_v42, %v1672_v42  ;;  %v486_v46 = vmul.f32 %v1676_v44, %v1676_v44 }
 0x137   : > { %v504_v61 = vadd.f32 %v486_v46, %v485_v45 }
 0x138   : > { %v438_v62 = vpop.xlane.xlu2 %437 }
 0x139   : > { %v459_v0 = vmul.f32 %v1628_v25, %v438_v62  ;;  %505 = vadd.xlane.f32.xlu2 %v504_v61 }
 0x13b   : > { %v1685_v49 = vsub.f32 %v416_v59, %v459_v0  ;;  %v1689_v51 = vsub.f32 %v417_v60, %v459_v0  ;;  %v1747_v0 = vperm.slane %v653_v54, 0 }
 0x13d   : > { %v487_v52 = vmul.f32 %v1685_v49, %v1685_v49  ;;  %v488_v53 = vmul.f32 %v1689_v51, %v1689_v51 }
 0x13f   : > { %v507_v4 = vadd.f32 %v488_v53, %v487_v52 }
 0x140   : > { %v441_v5 = vpop.xlane.xlu2 %440 }
 0x141   : > { %v460_v7 = vmul.f32 %v1628_v25, %v441_v5  ;;  %508 = vadd.xlane.f32.xlu0 %v507_v4  ;;  %v1750_v5 = vperm.slane %v653_v54, 1 }
 0x143   : > { %v1698_v56 = vsub.f32 %v418_v2, %v460_v7  ;;  %v1702_v58 = vsub.f32 %v419_v3, %v460_v7 }
 0x145   : > { %v489_v59 = vmul.f32 %v1698_v56, %v1698_v56  ;;  %v490_v60 = vmul.f32 %v1702_v58, %v1702_v58 }
 0x147   : > { %v510_v11 = vadd.f32 %v490_v60, %v489_v59 }
 0x148   : > { %v444_v12 = vpop.xlane.xlu0 %443 }
 0x149   : > { %v461_v14 = vmul.f32 %v1628_v25, %v444_v12  ;;  %511 = vadd.xlane.f32.xlu1 %v510_v11 }
 0x14b   : > { %v1711_v63 = vsub.f32 %v420_v9, %v461_v14  ;;  %v1715_v1 = vsub.f32 %v421_v10, %v461_v14 }
 0x14d   : > { %v491_v2 = vmul.f32 %v1711_v63, %v1711_v63  ;;  %v492_v3 = vmul.f32 %v1715_v1, %v1715_v1 }
 0x14f   : > { %v513_v18 = vadd.f32 %v492_v3, %v491_v2 }
 0x150   : > { %v447_v19 = vpop.xlane.xlu1 %446 }
 0x151   : > { %v462_v20 = vmul.f32 %v1628_v25, %v447_v19  ;;  %514 = vadd.xlane.f32.xlu2 %v513_v18 }
 0x153   : > { %v1724_v6 = vsub.f32 %v422_v16, %v462_v20  ;;  %v1728_v8 = vsub.f32 %v423_v17, %v462_v20 }
 0x155   : > { %v493_v9 = vmul.f32 %v1724_v6, %v1724_v6  ;;  %v494_v10 = vmul.f32 %v1728_v8, %v1728_v8 }
 0x157   : > { %v516_v21 = vadd.f32 %v494_v10, %v493_v9 }
 0x159   : > { %517 = vadd.xlane.f32.xlu0 %v516_v21 }
 0x194   : > { %v497_v22 = vpop.xlane.xlu2 %496 }
 0x195   : > { %v519_v23 = vmul.f32 %v497_v22, %v1628_v25 }
 0x197   : > { %v527_v24 = vadd.f32 1e-05, %v519_v23 }
 0x199   : > { %1289 = vrsqrt.f32 %v527_v24  ;;  %vm541_vm3 = vweird.f32 %v527_v24 }
 0x19c   : > { %v500_v13 = vpop.xlane.xlu0 %499 }
 0x19d   : > { %v520_v16 = vmul.f32 %v500_v13, %v1628_v25 }
 0x19f   : > { %v1290_v26 = vpop.eup %1289  ;;  %v528_v15 = vadd.f32 1e-05, %v520_v16 }
 0x1a0   : > { %v536_v17 = vmul.f32 %v1290_v26, %v527_v24  ;;  %vm542_vm2 = vweird.f32 %v1290_v26 }
 0x1a1   : > { %1291 = vrsqrt.f32 %v528_v15  ;;  %vm543_vm4 = vmor %vm541_vm3, %vm542_vm2  ;;  %vm551_vm6 = vweird.f32 %v528_v15 }
 0x1a2   : > { %v537_v27 = vmul.f32 %v1290_v26, %v536_v17 }
 0x1a4   : > { %v538_v34 = vmul.f32 0.5, %v537_v27  ;;  %v503_v36 = vpop.xlane.xlu1 %502 }
 0x1a5   : > { %v521_v40 = vmul.f32 %v503_v36, %v1628_v25 }
 0x1a6   : > { %v539_v41 = vsub.f32 1.5, %v538_v34 }
 0x1a7   : > { %v1292_v43 = vpop.eup %1291  ;;  %v529_v32 = vadd.f32 1e-05, %v521_v40 }
 0x1a8   : > { %v540_v47 = vmul.f32 %v1290_v26, %v539_v41  ;;  %v546_v48 = vmul.f32 %v1292_v43, %v528_v15  ;;  %vm552_vm5 = vweird.f32 %v1292_v43 }
 0x1a9   : > { %1293 = vrsqrt.f32 %v529_v32  ;;  %vm553_vm7 = vmor %vm551_vm6, %vm552_vm5  ;;  %vm561_vm9 = vweird.f32 %v529_v32 }
 0x1aa   : > { %v544_v38 = vsel %vm543_vm4, %v1290_v26, %v540_v47  ;;  %v547_v39 = vmul.f32 %v1292_v43, %v546_v48 }
 0x1ab   : > { %v615_v55 = vmul.f32 %v544_v38, %v1633_v29  ;;  %v616_v45 = vmul.f32 %v544_v38, %v1637_v33  ;;  %v1407_v29 = vmov 8.0  }
 0x1ac   : > { %v548_v46 = vmul.f32 0.5, %v547_v39  ;;  %v506_v61 = vpop.xlane.xlu2 %505  ;;  %1295 = vrcp.f32 %v1407_v29 }
 0x1ad   : > { %v522_v62 = vmul.f32 %v506_v61, %v1628_v25  ;;  %v637_v52 = vmul.f32 %v1740_v50, %v615_v55  ;;  %v638_v59 = vmul.f32 %v1743_v57, %v616_v45 }
 0x1ae   : > { %v549_v53 = vsub.f32 1.5, %v548_v46 }
 0x1af   : > { %v1294_v4 = vpop.eup %1293  ;;  %v1752_v7 = vadd.f32 1e-05, %v522_v62  ;;  %v659_v11 = vadd.f32 %v1747_v0, %v637_v52  ;;  %v660_v18 = vadd.f32 %v1750_v5, %v638_v59  ;;  %v1225_v52 = vld [vmem:[%s1992_s5 + $0x38] sm:$0xff] }
 0x1b0   : > { %v550_v33 = vmul.f32 %v1292_v43, %v549_v53  ;;  %v556_v60 = vmul.f32 %v1294_v4, %v529_v32  ;;  %vm562_vm8 = vweird.f32 %v1294_v4  ;;  %v1233_v53 = vld [vmem:[%s1992_s5 + $0x78] sm:$0xff]  ;;  %999 = vmatpush.bf16.msra.mxu2 %v1225_v52 }
 0x1b1   : > { %1297 = vrsqrt.f32 %v1752_v7  ;;  %v675_v21 = vrot.slane %v659_v11, 4  ;;  %v681_v16 = vrot.slane %v660_v18, 4  ;;  %vm563_vm10 = vmor %vm561_vm9, %vm562_vm8  ;;  %vm571_vm12 = vweird.f32 %v1752_v7  ;;  %1012 = vmatpush.bf16.msra.mxu3 %v1233_v53 }
 0x1b2   : > { %v554_v12 = vsel %vm553_vm7, %v1292_v43, %v550_v33  ;;  %v557_v14 = vmul.f32 %v1294_v4, %v556_v60  ;;  %v1760_v9 = vpop.eup %1295  ;;  %vm878_vm8 = vcmask 1041409  }
 0x1b3   : > { %v617_v2 = vmul.f32 %v554_v12, %v1646_v28  ;;  %v618_v3 = vmul.f32 %v554_v12, %v1650_v30  ;;  %v772_v17 = vmul.f32 8.0, %v1760_v9  ;;  %v676_v27 = vadd.f32 %v675_v21, %v659_v11 }
 0x1b4   : > { %v558_v19 = vmul.f32 0.5, %v557_v14  ;;  %v509_v20 = vpop.xlane.xlu0 %508  ;;  %v682_v40 = vadd.f32 %v681_v16, %v660_v18  ;;  %vm776_vm14 = vweird.f32 %v1760_v9 }
 0x1b5   : > { %v639_v10 = vmul.f32 %v1740_v50, %v617_v2  ;;  %v640_v22 = vmul.f32 %v1743_v57, %v618_v3  ;;  %v523_v24 = vmul.f32 %v509_v20, %v1628_v25  ;;  %v773_v38 = vsub.f32 1.0, %v772_v17  ;;  %v1224_v3 = vld [vmem:[%s1992_s5 + $0x30] sm:$0xff] }
 0x1b6   : > { %v559_v23 = vsub.f32 1.5, %v558_v19  ;;  %v677_v39 = vrot.slane %v676_v27, 2  ;;  %v683_v61 = vrot.slane %v682_v40, 2  ;;  %1000 = vmatpush.bf16.msra.mxu2 %v1224_v3 }
 0x1b7   : > { %v1298_v13 = vpop.eup %1297  ;;  %v1766_v26 = vadd.f32 1e-05, %v523_v24  ;;  %v661_v15 = vadd.f32 %v1747_v0, %v639_v10  ;;  %v662_v34 = vadd.f32 %v1750_v5, %v640_v22  ;;  %v774_v59 = vmul.f32 %v1760_v9, %v773_v38 }
 0x1b8   : > { %v560_v28 = vmul.f32 %v1294_v4, %v559_v23  ;;  %v566_v30 = vmul.f32 %v1298_v13, %v1752_v7  ;;  %vm572_vm11 = vweird.f32 %v1298_v13  ;;  %v678_v33 = vadd.f32 %v677_v39, %v676_v27  ;;  %v1232_v7 = vld [vmem:[%s1992_s5 + $0x70] sm:$0xff]  ;;  %v1223_v27 = vld [vmem:[%s1992_s5 + $0x28] sm:$0xff] }
 0x1b9   : > { %1299 = vrsqrt.f32 %v1766_v26  ;;  %v687_v47 = vrot.slane %v661_v15, 4  ;;  %v693_v54 = vrot.slane %v662_v34, 4  ;;  %vm573_vm13 = vmor %vm571_vm12, %vm572_vm11  ;;  %v684_v12 = vadd.f32 %v683_v61, %v682_v40  ;;  %1013 = vmatpush.bf16.msra.mxu3 %v1232_v7 }
 0x1ba   : > { %v567_v36 = vmul.f32 %v1298_v13, %v566_v30  ;;  %v564_v41 = vsel %vm563_vm10, %v1294_v4, %v560_v28  ;;  %v679_v10 = vrot.slane %v678_v33, 1  ;;  %v775_v23 = vadd.f32 %v1760_v9, %v774_v59  ;;  %1001 = vmatpush.bf16.msra.mxu2 %v1223_v27 }
 0x1bb   : > { %v619_v55 = vmul.f32 %v564_v41, %v1659_v35  ;;  %v688_v4 = vadd.f32 %v687_v47, %v661_v15  ;;  %v620_v29 = vmul.f32 %v564_v41, %v1663_v37  ;;  %v694_v60 = vadd.f32 %v693_v54, %v662_v34  ;;  %v1230_v47 = vld [vmem:[%s1992_s5 + $0x60] sm:$0xff] }
 0x1bc   : > { %v568_v43 = vmul.f32 0.5, %v567_v36  ;;  %v512_v31 = vpop.xlane.xlu1 %511  ;;  %v685_v30 = vrot.slane %v684_v12, 1  ;;  %vm581_vm0 = vweird.f32 %v1766_v26  ;;  %v1835_v39 = vsel %vm776_vm14, %v1760_v9, %v775_v23  ;;  %v1221_v9 = vld [vmem:[%s1992_s5 + $0x18] sm:$0xff] }
 0x1bd   : > { %v524_v48 = vmul.f32 %v512_v31, %v1628_v25  ;;  %v641_v11 = vmul.f32 %v1740_v50, %v619_v55  ;;  %v689_v18 = vrot.slane %v688_v4, 2  ;;  %v642_v19 = vmul.f32 %v1743_v57, %v620_v29  ;;  %v1222_v31 = vld [vmem:[%s1992_s5 + $0x20] sm:$0xff] }
 0x1be   : > { %v569_v32 = vsub.f32 1.5, %v568_v43  ;;  %v695_v21 = vrot.slane %v694_v60, 2  ;;  %v686_v54 = vadd.f32 %v685_v30, %v684_v12  ;;  %1002 = vmatpush.bf16.msra.mxu2 %v1222_v31  ;;  %vm880_vm12 = vcmask 1042434  }
 0x1bf   : > { %v1774_v45 = vadd.f32 1e-05, %v524_v48  ;;  %v1776_v46 = vpop.eup %1299  ;;  %v663_v24 = vadd.f32 %v1747_v0, %v641_v11  ;;  %v690_v34 = vadd.f32 %v689_v18, %v688_v4  ;;  %v664_v36 = vadd.f32 %v1750_v5, %v642_v19 }
 0x1c0   : > { %v570_v62 = vmul.f32 %v1298_v13, %v569_v32  ;;  %v576_v35 = vmul.f32 %v1776_v46, %v1766_v26  ;;  %vm582_vm15 = vweird.f32 %v1776_v46  ;;  %v696_v41 = vadd.f32 %v695_v21, %v694_v60  ;;  %v1228_v21 = vld [vmem:[%s1992_s5 + $0x50] sm:$0xff] }
 0x1c1   : > { %1301 = vrsqrt.f32 %v1774_v45  ;;  %v699_v26 = vrot.slane %v663_v24, 4  ;;  %vm583_vm1 = vmor %vm581_vm0, %vm582_vm15  ;;  %v705_v52 = vrot.slane %v664_v36, 4  ;;  %vm591_vm3 = vweird.f32 %v1774_v45 }
 0x1c2   : > { %v574_v14 = vsel %vm573_vm13, %v1298_v13, %v570_v62  ;;  %v577_v37 = vmul.f32 %v1776_v46, %v576_v35  ;;  %v691_v62 = vrot.slane %v690_v34, 1  ;;  %v697_v29 = vrot.slane %v696_v41, 1  ;;  %1003 = vmatpush.bf16.msra.mxu2 %v1221_v9 }
 0x1c3   : > { %v621_v13 = vmul.f32 %v574_v14, %v1672_v42  ;;  %v622_v15 = vmul.f32 %v574_v14, %v1676_v44  ;;  %v1231_v42 = vld [vmem:[%s1992_s5 + $0x68] sm:$0xff]  ;;  %v680_v44 = vadd.f32 %v679_v10, %v678_v33  ;;  %v700_v60 = vadd.f32 %v699_v26, %v663_v24  ;;  %v1220_v10 = vld [vmem:[%s1992_s5 + $0x10] sm:$0xff] }
 0x1c4   : > { %v515_v2 = vpop.xlane.xlu2 %514  ;;  %v578_v22 = vmul.f32 0.5, %v577_v37  ;;  %1014 = vmatpush.bf16.msra.mxu3 %v1231_v42  ;;  %v706_v3 = vadd.f32 %v705_v52, %v664_v36  ;;  %v1874_v23 = vmul.f32 %v1835_v39, %v686_v54  ;;  %v1880_v36 = vadd.f32 %v697_v29, %v696_v41  ;;  %v1218_v29 = vld [vmem:[%s1992_s5] sm:$0xff] }
 0x1c5   : > { %v525_v20 = vmul.f32 %v515_v2, %v1628_v25  ;;  %v643_v48 = vmul.f32 %v1740_v50, %v621_v13  ;;  %v644_v32 = vmul.f32 %v1743_v57, %v622_v15  ;;  %v778_v33 = vmul.f32 %v1835_v39, %v680_v44 }
 0x1c6   : > { %v579_v17 = vsub.f32 1.5, %v578_v22  ;;  %v692_v2 = vadd.f32 %v691_v62, %v690_v34  ;;  %1004 = vmatpush.bf16.msra.mxu2 %v1220_v10  ;;  %vm882_vm13 = vcmask 1043459   ;;  %vm884_vm14 = vcmask 1044484  }
 0x1c7   : > { %v1803_v16 = vadd.f32 1e-05, %v525_v20  ;;  %v1806_v28 = vpop.eup %1301  ;;  %v666_v12 = vadd.f32 %v1750_v5, %v644_v32  ;;  %v794_v22 = vpack.c.bf16 %v778_v33, %v778_v33  ;;  %vm886_vm15 = vcmask 1045509  }
 0x1c8   : > { %v586_v40 = vmul.f32 %v1806_v28, %v1774_v45  ;;  %v580_v43 = vmul.f32 %v1776_v46, %v579_v17  ;;  %1015 = vmatpush.bf16.msra.mxu3 %v1230_v47  ;;  %vm592_vm2 = vweird.f32 %v1806_v28  ;;  %v701_v45 = vrot.slane %v700_v60, 2 }
 0x1c9   : > { %1303 = vrsqrt.f32 %v1803_v16  ;;  %vm593_vm4 = vmor %vm591_vm3, %vm592_vm2  ;;  %v717_v13 = vrot.slane %v666_v12, 4  ;;  %v707_v17 = vrot.slane %v706_v3, 2  ;;  %v1889_v31 = vmul.f32 %v1835_v39, %v692_v2 }
 0x1ca   : > { %v587_v38 = vmul.f32 %v1806_v28, %v586_v40  ;;  %v584_v55 = vsel %vm583_vm1, %v1776_v46, %v580_v43  ;;  %v1229_v46 = vld [vmem:[%s1992_s5 + $0x58] sm:$0xff]  ;;  %v1219_v43 = vld [vmem:[%s1992_s5 + $0x8] sm:$0xff]  ;;  %v1893_v47 = vunpack.c.l.b16 %v794_v22  ;;  %vm601_vm6 = vweird.f32 %v1803_v16 }
 0x1cb   : > { %v623_v53 = vmul.f32 %v584_v55, %v1685_v49  ;;  %v624_v4 = vmul.f32 %v584_v55, %v1689_v51  ;;  %v665_v49 = vadd.f32 %v1747_v0, %v643_v48  ;;  %v708_v32 = vadd.f32 %v707_v17, %v706_v3  ;;  %1005 = vmatpush.bf16.msra.mxu2 %v1219_v43 }
 0x1cc   : > { %v518_v61 = vpop.xlane.xlu0 %517  ;;  %v588_v35 = vmul.f32 0.5, %v587_v38  ;;  %1016 = vmatpush.bf16.msra.mxu3 %v1229_v46  ;;  %v718_v38 = vadd.f32 %v717_v13, %v666_v12  ;;  %vm888_vm0 = vcmask 1046534   ;;  %vm890_vm1 = vcmask 1047559  }
 0x1cd   : > { %v526_v59 = vmul.f32 %v518_v61, %v1628_v25  ;;  %v645_v51 = vmul.f32 %v1740_v50, %v623_v53  ;;  %v646_v11 = vmul.f32 %v1743_v57, %v624_v4  ;;  %v711_v24 = vrot.slane %v665_v49, 4 }
 0x1ce   : > { %v589_v14 = vsub.f32 1.5, %v588_v35  ;;  %v1226_v35 = vld [vmem:[%s1992_s5 + $0x40] sm:$0xff]  ;;  %v709_v3 = vrot.slane %v708_v32, 1 }
 0x1cf   : > { %v1852_v25 = vpop.eup %1303  ;;  %v1856_v37 = vadd.f32 1e-05, %v526_v59  ;;  %v667_v7 = vadd.f32 %v1747_v0, %v645_v51  ;;  %v668_v18 = vadd.f32 %v1750_v5, %v646_v11  ;;  %v712_v48 = vadd.f32 %v711_v24, %v665_v49  ;;  %1006 = vmatpush.bf16.msra.mxu2 %v1218_v29 }
 0x1d0   : > { %v590_v19 = vmul.f32 %v1806_v28, %v589_v14  ;;  %v596_v20 = vmul.f32 %v1852_v25, %v1803_v16  ;;  %1017 = vmatpush.bf16.msra.mxu3 %v1228_v21  ;;  %vm602_vm5 = vweird.f32 %v1852_v25  ;;  %v796_v16 = vpack.c.bf16 %v1889_v31, %v1889_v31 }
 0x1d1   : > { %1305 = vrsqrt.f32 %v1856_v37  ;;  %v723_v27 = vrot.slane %v667_v7, 4  ;;  %v729_v40 = vrot.slane %v668_v18, 4  ;;  %vm603_vm7 = vmor %vm601_vm6, %vm602_vm5  ;;  %v713_v33 = vrot.slane %v712_v48, 2 }
 0x1d2   : > { %v594_v30 = vsel %vm593_vm4, %v1806_v28, %v590_v19  ;;  %v597_v15 = vmul.f32 %v1852_v25, %v596_v20  ;;  %v1227_v28 = vld [vmem:[%s1992_s5 + $0x48] sm:$0xff]  ;;  %vm611_vm10 = vweird.f32 %v1856_v37 }
 0x1d3   : > { %v625_v42 = vmul.f32 %v594_v30, %v1698_v56  ;;  %v626_v34 = vmul.f32 %v594_v30, %v1702_v58  ;;  %v702_v56 = vadd.f32 %v701_v45, %v700_v60  ;;  %v724_v55 = vadd.f32 %v723_v27, %v667_v7 }
 0x1d4   : > { %v598_v44 = vmul.f32 0.5, %v597_v15  ;;  %v730_v52 = vadd.f32 %v729_v40, %v668_v18  ;;  %1018 = vmatpush.bf16.msra.mxu3 %v1227_v28  ;;  %v719_v60 = vrot.slane %v718_v38, 2  ;;  %v714_v45 = vadd.f32 %v713_v33, %v712_v48 }
 0x1d5   : > { %v647_v58 = vmul.f32 %v1740_v50, %v625_v42  ;;  %v648_v41 = vmul.f32 %v1743_v57, %v626_v34  ;;  %v703_v59 = vrot.slane %v702_v56, 1  ;;  %v725_v7 = vrot.slane %v724_v55, 2 }
 0x1d6   : > { %v599_v54 = vsub.f32 1.5, %v598_v44  ;;  %v731_v18 = vrot.slane %v730_v52, 2  ;;  %v720_v22 = vadd.f32 %v719_v60, %v718_v38  ;;  %v710_v42 = vadd.f32 %v709_v3, %v708_v32 }
 0x1d7   : > { %v1306_v26 = vpop.eup %1305  ;;  %v669_v61 = vadd.f32 %v1747_v0, %v647_v58  ;;  %v670_v62 = vadd.f32 %v1750_v5, %v648_v41  ;;  %v726_v30 = vadd.f32 %v725_v7, %v724_v55  ;;  %v715_v43 = vrot.slane %v714_v45, 1 }
 0x1d8   : > { %v600_v53 = vmul.f32 %v1852_v25, %v599_v54  ;;  %v606_v4 = vmul.f32 %v1306_v26, %v1856_v37  ;;  %1019 = vmatpush.bf16.msra.mxu3 %v1226_v35  ;;  %vm612_vm9 = vweird.f32 %v1306_v26  ;;  %v732_v15 = vadd.f32 %v731_v18, %v730_v52 }
 0x1d9   : > { %v735_v9 = vrot.slane %v669_v61, 4  ;;  %v741_v46 = vrot.slane %v670_v62, 4  ;;  %vm613_vm11 = vmor %vm611_vm10, %vm612_vm9  ;;  %v721_v28 = vrot.slane %v720_v22, 1  ;;  %v864_v58 = vunpack.c.l.b16 %v796_v16 }
 0x1da   : > { %v604_v49 = vsel %vm603_vm7, %v1852_v25, %v600_v53  ;;  %v607_v51 = vmul.f32 %v1306_v26, %v606_v4  ;;  %v727_v38 = vrot.slane %v726_v30, 1  ;;  %v733_v55 = vrot.slane %v732_v15, 1 }
 0x1db   : > { %v736_v11 = vadd.f32 %v735_v9, %v669_v61  ;;  %v742_v12 = vadd.f32 %v741_v46, %v670_v62  ;;  %v627_v14 = vmul.f32 %v604_v49, %v1711_v63  ;;  %v628_v2 = vmul.f32 %v604_v49, %v1715_v1 }
 0x1dc   : > { %v608_v19 = vmul.f32 0.5, %v607_v51  ;;  %v704_v63 = vadd.f32 %v703_v59, %v702_v56  ;;  %v716_v4 = vadd.f32 %v715_v43, %v714_v45  ;;  %v781_v9 = vmul.f32 %v1835_v39, %v1880_v36 }
 0x1dd   : > { %v649_v20 = vmul.f32 %v1740_v50, %v627_v14  ;;  %v650_v10 = vmul.f32 %v1743_v57, %v628_v2  ;;  %v737_v21 = vrot.slane %v736_v11, 2  ;;  %v743_v25 = vrot.slane %v742_v12, 2 }
 0x1de   : > { %v609_v24 = vsub.f32 1.5, %v608_v19  ;;  %v782_v37 = vmul.f32 %v1835_v39, %v704_v63  ;;  %v728_v46 = vadd.f32 %v727_v38, %v726_v30  ;;  %v734_v16 = vadd.f32 %v733_v55, %v732_v15 }
 0x1df   : > { %v671_v1 = vadd.f32 %v1747_v0, %v649_v20  ;;  %v672_v13 = vadd.f32 %v1750_v5, %v650_v10  ;;  %v738_v27 = vadd.f32 %v737_v21, %v736_v11  ;;  %v744_v44 = vadd.f32 %v743_v25, %v742_v12 }
 0x1e0   : > { %v610_v17 = vmul.f32 %v1306_v26, %v609_v24  ;;  %v798_v11 = vpack.c.bf16 %v782_v37, %v782_v37  ;;  %v786_v3 = vmul.f32 %v1835_v39, %v728_v46  ;;  %v787_v19 = vmul.f32 %v1835_v39, %v734_v16 }
 0x1e1   : > { %v747_v34 = vrot.slane %v671_v1, 4  ;;  %v753_v40 = vrot.slane %v672_v13, 4  ;;  %v739_v54 = vrot.slane %v738_v27, 1  ;;  %v745_v53 = vrot.slane %v744_v44, 1 }
 0x1e2   : > { %v614_v31 = vsel %vm613_vm11, %v1306_v26, %v610_v17  ;;  %v879_v26 = vsel %vm878_vm8, %v864_v58, %v1893_v47  ;;  %v784_v47 = vmul.f32 %v1835_v39, %v716_v4  ;;  %v797_v25 = vpack.c.bf16 %v781_v9, %v781_v9 }
 0x1e3   : > { %v629_v56 = vmul.f32 %v614_v31, %v1724_v6  ;;  %v630_v41 = vmul.f32 %v614_v31, %v1728_v8  ;;  %v748_v48 = vadd.f32 %v747_v34, %v671_v1  ;;  %v754_v61 = vadd.f32 %v753_v40, %v672_v13 }
 0x1e4   : > { %v722_v6 = vadd.f32 %v721_v28, %v720_v22  ;;  %v746_v49 = vadd.f32 %v745_v53, %v744_v44  ;;  %v800_v22 = vpack.c.bf16 %v784_v47, %v784_v47  ;;  %v795_v30 = vpack.c.bf16 %v1874_v23, %v1874_v23 }
 0x1e5   : > { %v651_v32 = vmul.f32 %v1740_v50, %v629_v56  ;;  %v652_v62 = vmul.f32 %v1743_v57, %v630_v41  ;;  %v749_v52 = vrot.slane %v748_v48, 2  ;;  %v755_v29 = vrot.slane %v754_v61, 2 }
 0x1e6   : > { %v740_v50 = vadd.f32 %v739_v54, %v738_v27  ;;  %v785_v36 = vmul.f32 %v1835_v39, %v722_v6  ;;  %v789_v21 = vmul.f32 %v1835_v39, %v746_v49  ;;  %v802_v17 = vpack.c.bf16 %v786_v3, %v786_v3 }
 0x1e7   : > { %v673_v8 = vadd.f32 %v1747_v0, %v651_v32  ;;  %v674_v35 = vadd.f32 %v1750_v5, %v652_v62  ;;  %v750_v59 = vadd.f32 %v749_v52, %v748_v48  ;;  %v756_v57 = vadd.f32 %v755_v29, %v754_v61 }
 0x1e8   : > { %v783_v0 = vmul.f32 %v1835_v39, %v710_v42  ;;  %v788_v7 = vmul.f32 %v1835_v39, %v740_v50  ;;  %v801_v15 = vpack.c.bf16 %v785_v36, %v785_v36  ;;  %v866_v42 = vunpack.c.l.b16 %v798_v11 }
 0x1e9   : > { %v751_v33 = vrot.slane %v750_v59, 1  ;;  %v759_v60 = vrot.slane %v673_v8, 4  ;;  %v765_v51 = vrot.slane %v674_v35, 4  ;;  %v757_v12 = vrot.slane %v756_v57, 1 }
 0x1ea   : > { %v799_v63 = vpack.c.bf16 %v783_v0, %v783_v0  ;;  %v804_v27 = vpack.c.bf16 %v788_v7, %v788_v7  ;;  %v803_v34 = vpack.c.bf16 %v787_v19, %v787_v19  ;;  %v805_v43 = vpack.c.bf16 %v789_v21, %v789_v21  ;;  %v1286_v0 = vld [vmem:[%s1993_s6] ss:$0 sm:$0xff] }
 0x1eb   : > { %v752_v5 = vadd.f32 %v751_v33, %v750_v59  ;;  %v760_v14 = vadd.f32 %v759_v60, %v673_v8  ;;  %v766_v2 = vadd.f32 %v765_v51, %v674_v35  ;;  %v758_v18 = vadd.f32 %v757_v12, %v756_v57 }
 0x1ec   : > { %v865_v28 = vunpack.c.l.b16 %v797_v25  ;;  %v868_v58 = vunpack.c.l.b16 %v800_v22  ;;  %v867_v41 = vunpack.c.l.b16 %v799_v63  ;;  %v863_v38 = vunpack.c.l.b16 %v795_v30 }
 0x1ed   : > { %v761_v20 = vrot.slane %v760_v14, 2  ;;  %v767_v10 = vrot.slane %v766_v2, 2  ;;  %v790_v45 = vmul.f32 %v1835_v39, %v752_v5  ;;  %v791_v24 = vmul.f32 %v1835_v39, %v758_v18 }
 0x1ee   : > { %v869_v54 = vunpack.c.l.b16 %v801_v15  ;;  %v870_v55 = vunpack.c.l.b16 %v802_v17  ;;  %v872_v61 = vunpack.c.l.b16 %v804_v27  ;;  %v881_v23 = vsel %vm880_vm12, %v866_v42, %v879_v26 }
 0x1ef   : > { %v762_v1 = vadd.f32 %v761_v20, %v760_v14  ;;  %v768_v13 = vadd.f32 %v767_v10, %v766_v2  ;;  %v806_v31 = vpack.c.bf16 %v790_v45, %v790_v45  ;;  %v807_v56 = vpack.c.bf16 %v791_v24, %v791_v24 }
 0x1f0   : > { %v871_v32 = vunpack.c.l.b16 %v803_v34  ;;  %v873_v53 = vunpack.c.l.b16 %v805_v43  ;;  %v892_v4 = vsel %vm878_vm8, %v865_v28, %v863_v38  ;;  %v883_v59 = vsel %vm882_vm13, %v868_v58, %v881_v23 }
 0x1f1   : > { %v763_v40 = vrot.slane %v762_v1, 1  ;;  %v769_v44 = vrot.slane %v768_v13, 1  ;;  %v874_v6 = vunpack.c.l.b16 %v806_v31  ;;  %v875_v29 = vunpack.c.l.b16 %v807_v56 }
 0x1f2   : > { %v893_v8 = vsel %vm880_vm12, %v867_v41, %v892_v4  ;;  %v885_v26 = vsel %vm884_vm14, %v870_v55, %v883_v59 }
 0x1f3   : > { %v764_v48 = vadd.f32 %v763_v40, %v762_v1  ;;  %v770_v37 = vadd.f32 %v769_v44, %v768_v13  ;;  %v894_v46 = vsel %vm882_vm13, %v869_v54, %v893_v8  ;;  %v887_v16 = vsel %vm886_vm15, %v872_v61, %v885_v26 }
 0x1f4   : > { %v889_v60 = vsel %vm888_vm0, %v874_v6, %v887_v16 }
 0x1f5   : > { %v792_v62 = vmul.f32 %v1835_v39, %v764_v48  ;;  %v793_v52 = vmul.f32 %v1835_v39, %v770_v37  ;;  %v895_v39 = vsel %vm884_vm14, %v871_v32, %v894_v46 }
 0x1f6   : > { %v896_v33 = vsel %vm886_vm15, %v873_v53, %v895_v39 }
 0x1f7   : > { %v808_v35 = vpack.c.bf16 %v792_v62, %v792_v62  ;;  %v809_v9 = vpack.c.bf16 %v793_v52, %v793_v52  ;;  %v897_v49 = vsel %vm888_vm0, %v875_v29, %v896_v33 }
 0x1f9   : > { %v876_v50 = vunpack.c.l.b16 %v808_v35  ;;  %v877_v57 = vunpack.c.l.b16 %v809_v9 }
 0x1fb   : > { %v891_v51 = vsel %vm890_vm1, %v876_v50, %v889_v60  ;;  %v898_v47 = vsel %vm890_vm1, %v877_v57, %v897_v49 }
 0x1fc   : > { %v899_v11 = vpack.c.b16 %v891_v51, %v891_v51  ;;  %v900_v12 = vpack.c.b16 %v898_v47, %v898_v47 }
 0x1fe   : > { %1007 = vmatmul.bf16.vlgmr.msra.gmra.mxu2 %v899_v11  ;;  %1020 = vmatmul.bf16.vlgmr.msra.gmra.mxu3 %v900_v12 }
 0x281   : > { %v1008_v5 = vpop.f32.mrf.mxu2  ;;  %v1021_v14 = vpop.f32.mrf.mxu3 }
 0x282   : > { %v1009_v2 = vadd.f32 %v1286_v0, %v1008_v5 }
 0x284   : > { %v1022_v36 = vadd.f32 %v1021_v14, %v1009_v2 }
 0x286   : > { %1025 = vst [vmem:[%s287_s13] sm:$0xff] %v1022_v36 }
 0x287   : > { %1364 = shalt.err (!%p1361_p8)
}
 0x288   : > { %1238 = dma.vmem_to_hbm [thread:$0]  (%p1483_p5), %s1040_s28, 128, %s1042_s14, %s1027_s15  }
 0x289   : > { %v1010_v3 = vpop.f32.mrf.mxu2  ;;  %v1023_v7 = vpop.f32.mrf.mxu3 }
 0x28a PF: > { %p1250_p9 = scmp.ge.s32.totalorder %s1403_s27, 2  ;;  %s1053_s21 = sand.u32 1, %s1391_s24  }
 0x28b   : > { %s1054_s29 = scalar_lea.sflag [#allocation4], %s1053_s21 }
 0x28c   : > { %p1245_p10 = pnand %p1250_p9, %p1487_p6 }
 0x28e   : > { %p1246_p11 = pneg %p1245_p10 }
 0x290   : > { %1386 = dma.done.wait (%p1246_p11), %s1054_s29, 128  }
 0x291   : > { %1388 = vsyncadd (%p1246_p11), %s1054_s29, 4294967168  ;;  %p18_p5 = scmp.ge.s32.totalorder %s1471_s30, 4   ;;  %s1997_s24 = smov %s1395_s25 }
 0x292   : > { %s1998_s25 = smov %s1399_s26  ;;  %s1999_s26 = smov %s1481_s10 }
 0x293   : > { %s2000_s27 = smov %s1471_s30  ;;  %20 = sbr.rel (!%p18_p5) target bundleno = 4 (0x4), region = 88 }
 0x298   :  { %1060 = vsyncpa [#allocation3], 1 }
 0x299   :  { %1062 = vsyncpa [#allocation3 + $0x1], 1 }
 0x29a   :  { %1063 = vsyncpa [#allocation4], 1 }
 0x29b   :  { %1065 = vsyncpa [#allocation4 + $0x1], 1 }

</bundles_post_ra>
